<compile_context>
chip_gen: v6e
topology: v6e:2x2x1
jax: 0.10.0
libtpu: 0.0.40
codegen_flags: <defaults>
</compile_context>

<pallas_src>
import functools
import math

import jax
import jax.numpy as jnp
from jax import lax
from jax.experimental import pallas as pl
from jax.experimental.pallas import tpu as pltpu


# ---------------------------------------------------------------------------
# Tile-size helpers
# ---------------------------------------------------------------------------
def _cap_tile(dim: int, cap: int, align: int) -> int:
    """Full dim if it fits under the cap, else the largest aligned tile <= cap.

    Used for non-contracted dims: ragged last blocks (cdiv grid) are safe
    because garbage-padded rows/cols never cross into valid output elements.
    """
    if dim <= cap:
        return dim
    return max((cap // align) * align, align)


def _exact_tile(dim: int, cap: int, align: int) -> int:
    """Largest aligned tile <= cap that divides dim exactly, else the full dim.

    Used for contracted / summed-over axes, where a ragged (garbage-padded)
    block would corrupt the accumulation.
    """
    if dim <= cap:
        return dim
    t = (cap // align) * align
    while t >= align:
        if dim % t == 0:
            return t
        t -= align
    return dim


# ---------------------------------------------------------------------------
# Batched linear:  y[g] = x @ w[g] + b[g]        (w pre-transposed to (in,out))
# ---------------------------------------------------------------------------
def _linear_kernel(x_ref, w_ref, b_ref, o_ref, acc_ref):
    """One (tm, tn) output tile of group g. Grid = (G, M/tm, N/tn, K/tk); the
    K axis is innermost ("arbitrary") and accumulated in f32 VMEM scratch.
    Matmul operands are bf16; accumulation is f32."""
    kb = pl.program_id(3)

    @pl.when(kb == 0)
    def _():
        acc_ref[...] = jnp.zeros_like(acc_ref)

    acc_ref[...] += jnp.dot(
        x_ref[...].astype(jnp.bfloat16),
        w_ref[...].astype(jnp.bfloat16),
        preferred_element_type=jnp.float32,
    )

    @pl.when(kb == pl.num_programs(3) - 1)
    def _():
        o_ref[...] = (acc_ref[...] + b_ref[...].astype(jnp.float32)).astype(o_ref.dtype)


def batched_linear(x2d, w, b, *, tm_cap=512, tn_cap=512, tk_cap=512):
    """x2d: (M, Din) activations; w: (G, Din, Dout) weights (bf16 recommended);
    b: (G, 1, Dout) biases (f32).  Returns (G, M, Dout)."""
    m, d_in = x2d.shape
    g, _, d_out = w.shape
    tm = _cap_tile(m, tm_cap, 8)          # sublane dim of x / out blocks
    tn = _cap_tile(d_out, tn_cap, 128)    # lane dim of w / b / out blocks
    tk = _exact_tile(d_in, tk_cap, 128)   # contracted dim: tile exactly
    grid = (g, pl.cdiv(m, tm), pl.cdiv(d_out, tn), d_in // tk)
    return pl.pallas_call(
        _linear_kernel,
        out_shape=jax.ShapeDtypeStruct((g, m, d_out), x2d.dtype),
        grid_spec=pltpu.PrefetchScalarGridSpec(
            num_scalar_prefetch=0,
            grid=grid,
            in_specs=[
                pl.BlockSpec((tm, tk), lambda gi, i, n, kb: (i, kb)),
                pl.BlockSpec((pl.Squeezed(), tk, tn),
                             lambda gi, i, n, kb: (gi, kb, n)),
                pl.BlockSpec((pl.Squeezed(), 1, tn),
                             lambda gi, i, n, kb: (gi, 0, n)),
            ],
            out_specs=pl.BlockSpec((pl.Squeezed(), tm, tn),
                                   lambda gi, i, n, kb: (gi, i, n)),
            scratch_shapes=[pltpu.VMEM((tm, tn), jnp.float32)],
        ),
        compiler_params=pltpu.CompilerParams(
            dimension_semantics=("parallel", "parallel", "parallel", "arbitrary")),
    )(x2d, w, b)


# ---------------------------------------------------------------------------
# Attention core: per-(q,k) softmax over the HEADS axis (torch dim=1), fused
# head split/combine, Sk-tiled with an output accumulator.
# ---------------------------------------------------------------------------
def _attention_kernel(q_ref, k_ref, v_ref, o_ref, acc_ref, *, num_heads, d_k, scale):
    """One (tq, D) output tile for one batch element.
    q_ref: (tq, D); k_ref/v_ref: (tk, D); D = num_heads * d_k.
    Heads are peeled with static lane slices; softmax normalizes over heads,
    so each Sk tile's p@v contribution is summed into f32 VMEM scratch."""
    kb = pl.program_id(2)

    @pl.when(kb == 0)
    def _():
        acc_ref[...] = jnp.zeros_like(acc_ref)

    # Pre-scale q by 1/sqrt(d_k) (tq*D mults instead of H*tq*tk), then cast the
    # MXU operands to bf16.  Softmax math below stays in f32 (v5e-safe).
    q = (q_ref[...] * scale).astype(jnp.bfloat16)   # (tq, D)
    k = k_ref[...].astype(jnp.bfloat16)             # (tk, D)
    v = v_ref[...].astype(jnp.bfloat16)             # (tk, D)

    dn = (((1,), (1,)), ((), ()))                   # contract d_k: q_h @ k_h^T
    scores = []
    for h in range(num_heads):
        lo = h * d_k
        scores.append(lax.dot_general(
            q[:, lo:lo + d_k], k[:, lo:lo + d_k], dn,
            preferred_element_type=jnp.float32))    # (tq, tk)

    # Softmax over the heads axis: p_h = exp(s_h - m) / sum_h exp(s_h - m).
    m = scores[0]
    for h in range(1, num_heads):
        m = jnp.maximum(m, scores[h])
    exps = [jnp.exp(s - m) for s in scores]
    denom = exps[0]
    for h in range(1, num_heads):
        denom = denom + exps[h]
    inv = pl.reciprocal(denom, approx=True)         # one EUP op, not H divides

    outs = []
    for h in range(num_heads):
        p_h = (exps[h] * inv).astype(jnp.bfloat16)  # (tq, tk)
        outs.append(jnp.dot(p_h, v[:, h * d_k:(h + 1) * d_k],
                            preferred_element_type=jnp.float32))  # (tq, d_k)

    # combine_heads fused: lane-dense (tq, D) accumulate.
    acc_ref[...] += jnp.concatenate(outs, axis=-1)

    @pl.when(kb == pl.num_programs(2) - 1)
    def _():
        o_ref[...] = acc_ref[...].astype(o_ref.dtype)


def attention_core(q_arr, k_arr, v_arr, *, num_heads, d_k, slots=(0, 0, 0),
                   tq_cap=128, tk_cap=128):
    """q_arr/k_arr/v_arr: (G, B, S, D) projected activations (may all be the
    same fused (3, B, S, D) array); `slots` picks which leading index holds the
    q/k/v projection.  Returns (B, Sq, D) with heads already recombined."""
    _, batch, sq, d = q_arr.shape
    _, _, sk, _ = k_arr.shape
    tq = _cap_tile(sq, tq_cap, 8)
    tk = _exact_tile(sk, tk_cap, 8)     # summed over -> tile exactly
    grid = (batch, pl.cdiv(sq, tq), sk // tk)
    sq_slot, sk_slot, sv_slot = slots
    kernel = functools.partial(_attention_kernel, num_heads=num_heads,
                               d_k=d_k, scale=1.0 / math.sqrt(d_k))
    return pl.pallas_call(
        kernel,
        out_shape=jax.ShapeDtypeStruct((batch, sq, d), q_arr.dtype),
        grid_spec=pltpu.PrefetchScalarGridSpec(
            num_scalar_prefetch=0,
            grid=grid,
            in_specs=[
                pl.BlockSpec((pl.Squeezed(), pl.Squeezed(), tq, d),
                             lambda b, i, kb: (sq_slot, b, i, 0)),
                pl.BlockSpec((pl.Squeezed(), pl.Squeezed(), tk, d),
                             lambda b, i, kb: (sk_slot, b, kb, 0)),
                pl.BlockSpec((pl.Squeezed(), pl.Squeezed(), tk, d),
                             lambda b, i, kb: (sv_slot, b, kb, 0)),
            ],
            out_specs=pl.BlockSpec((pl.Squeezed(), tq, d),
                                   lambda b, i, kb: (b, i, 0)),
            scratch_shapes=[pltpu.VMEM((tq, d), jnp.float32)],
        ),
        compiler_params=pltpu.CompilerParams(
            dimension_semantics=("parallel", "parallel", "arbitrary")),
    )(q_arr, k_arr, v_arr)


# ---------------------------------------------------------------------------
# Full MultiHeadAttention forward
# ---------------------------------------------------------------------------
def multi_head_attention_forward(query, key, value, params, num_heads, mask=None):
    if mask is not None:
        # TODO(synk): optional mask path (masked_fill(mask == 0, -1e9) applied
        # to the score tile before the heads-softmax) is not wired in.
        raise NotImplementedError("mask is not supported by this Pallas kernel")

    batch, sq, dim = query.shape
    d_k = dim // num_heads
    to_bf16 = lambda w: w.astype(jnp.bfloat16)   # weights bf16 -> half the DMA

    if (query is key) and (key is value):
        # Self-attention: fuse the three projections into one pallas_call and
        # feed the (3, B, S, D) result straight into the attention kernel.
        w_qkv = to_bf16(jnp.stack([params["wq"].T, params["wk"].T, params["wv"].T]))
        b_qkv = jnp.stack([params["bq"], params["bk"], params["bv"]])[:, None, :]
        qkv = batched_linear(query.reshape(batch * sq, dim), w_qkv, b_qkv)
        qkv = qkv.reshape(3, batch, sq, dim)     # contiguous reshape, no copy
        attn = attention_core(qkv, qkv, qkv, num_heads=num_heads, d_k=d_k,
                              slots=(0, 1, 2))
    else:
        def proj(x, w, b):
            bsz, s, _ = x.shape
            y = batched_linear(x.reshape(bsz * s, dim),
                               to_bf16(w.T)[None], b[None, None, :])
            return y.reshape(1, bsz, s, dim)
        q_arr = proj(query, params["wq"], params["bq"])
        k_arr = proj(key, params["wk"], params["bk"])
        v_arr = proj(value, params["wv"], params["bv"])
        attn = attention_core(q_arr, k_arr, v_arr, num_heads=num_heads,
                              d_k=d_k, slots=(0, 0, 0))

    out = batched_linear(attn.reshape(batch * sq, dim),
                         to_bf16(params["wo"].T)[None],
                         params["bo"][None, None, :])
    return out.reshape(batch, sq, dim)


# ---------------------------------------------------------------------------
# Parameter init (mirrors nn.Linear default U(-1/sqrt(in), 1/sqrt(in))) + ref
# ---------------------------------------------------------------------------
def init_params(key, dim):
    ks = jax.random.split(key, 8)
    bound = 1.0 / math.sqrt(dim)
    u = lambda k, shape: jax.random.uniform(k, shape, jnp.float32, -bound, bound)
    return {
        "wq": u(ks[0], (dim, dim)), "bq": u(ks[1], (dim,)),
        "wk": u(ks[2], (dim, dim)), "bk": u(ks[3], (dim,)),
        "wv": u(ks[4], (dim, dim)), "bv": u(ks[5], (dim,)),
        "wo": u(ks[6], (dim, dim)), "bo": u(ks[7], (dim,)),
    }


def mha_reference(query, key, value, p, num_heads):
    batch, seq, dim = query.shape
    dk = dim // num_heads
    lin = lambda x, w, b: x @ w.T + b
    sh = lambda x: x.reshape(batch, -1, num_heads, dk).transpose(0, 2, 1, 3)
    q = sh(lin(query, p["wq"], p["bq"]))
    k = sh(lin(key, p["wk"], p["bk"]))
    v = sh(lin(value, p["wv"], p["bv"]))
    s = jnp.einsum("bhqd,bhkd->bhqk", q, k) / math.sqrt(dk)
    probs = jax.nn.softmax(s, axis=1)   # matches torch.softmax(dim=1): heads axis
    o = jnp.einsum("bhqk,bhkd->bhqd", probs, v)
    o = o.transpose(0, 2, 1, 3).reshape(batch, seq, dim)
    return lin(o, p["wo"], p["bo"])


if __name__ == "__main__":
    B, S, D, H = 2, 8, 32, 4

    key = jax.random.PRNGKey(0)
    k_x, k_y, k_p = jax.random.split(key, 3)
    x = jax.random.normal(k_x, (B, S, D), dtype=jnp.float32)
    params = init_params(k_p, D)

    # Self-attention (fused QKV projection path).
    out = jax.block_until_ready(
        multi_head_attention_forward(x, x, x, params, num_heads=H))
    ref = mha_reference(x, x, x, params, num_heads=H)
    assert out.shape == (B, S, D)
    diff = float(jnp.max(jnp.abs(out - ref)))
    assert jnp.allclose(out, ref, atol=2e-2, rtol=2e-2), (
        f"self-attention mismatch vs reference: max abs diff = {diff}")

    # Cross-attention (separate projections path).
    y = jax.random.normal(k_y, (B, S, D), dtype=jnp.float32)
    out2 = jax.block_until_ready(
        multi_head_attention_forward(x, y, y, params, num_heads=H))
    ref2 = mha_reference(x, y, y, params, num_heads=H)
    diff2 = float(jnp.max(jnp.abs(out2 - ref2)))
    assert jnp.allclose(out2, ref2, atol=2e-2, rtol=2e-2), (
        f"cross-attention mismatch vs reference: max abs diff = {diff2}")

    print("KERNEL_OK")
</pallas_src>

<mosaic_0001>
module attributes {stable_mosaic.version = 11 : i64} {
  func.func @_linear_kernel(%arg0: i32, %arg1: i32, %arg2: i32, %arg3: i32, %arg4: memref<16x32xf32, #tpu.memory_space<vmem>>, %arg5: memref<1x32x32xbf16, #tpu.memory_space<vmem>>, %arg6: memref<1x1x32xf32, #tpu.memory_space<vmem>>, %arg7: memref<1x16x32xf32, #tpu.memory_space<vmem>>, %arg8: memref<16x32xf32, #tpu.memory_space<vmem>>) attributes {dimension_semantics = [#tpu.dimension_semantics<parallel>, #tpu.dimension_semantics<parallel>, #tpu.dimension_semantics<parallel>, #tpu.dimension_semantics<arbitrary>], iteration_bounds = array<i64: 3, 1, 1, 1>, scalar_prefetch = 0 : i64, scratch_operands = 1 : i64, tpu.core_type = #tpu.core_type<tc>, window_params = [{transform_indices = @transform_0, window_bounds = array<i64: 16, 32>}, {transform_indices = @transform_1, window_bounds = array<i64: 1, 32, 32>}, {transform_indices = @transform_2, window_bounds = array<i64: 1, 1, 32>}, {transform_indices = @transform_3, window_bounds = array<i64: 1, 16, 32>}]} {
    %c0_i32 = arith.constant 0 : i32
    %0 = arith.cmpi eq, %arg3, %c0_i32 : i32
    %1 = arith.extui %0 : i1 to i32
    %c0_i32_0 = arith.constant 0 : i32
    %2 = arith.cmpi ne, %1, %c0_i32_0 : i32
    scf.if %2 {
      %cst_11 = arith.constant 0.000000e+00 : f32
      %14 = vector.broadcast %cst_11 : f32 to vector<16x32xf32>
      %c0_12 = arith.constant 0 : index
      %c0_13 = arith.constant 0 : index
      %15 = vector.load %arg8[%c0_12, %c0_13] : memref<16x32xf32, #tpu.memory_space<vmem>>, vector<16x32xf32>
      tpu.vector_store %arg8[%c0_12, %c0_13], %14 {strides = array<i32>} : memref<16x32xf32, #tpu.memory_space<vmem>>, vector<16x32xf32>,
    } else {
    }
    %c0 = arith.constant 0 : index
    %c0_1 = arith.constant 0 : index
    %3 = vector.load %arg8[%c0, %c0_1] : memref<16x32xf32, #tpu.memory_space<vmem>>, vector<16x32xf32>
    %c0_2 = arith.constant 0 : index
    %c0_3 = arith.constant 0 : index
    %4 = vector.load %arg4[%c0_2, %c0_3] : memref<16x32xf32, #tpu.memory_space<vmem>>, vector<16x32xf32>
    %5 = arith.truncf %4 : vector<16x32xf32> to vector<16x32xbf16>
    %c0_4 = arith.constant 0 : index
    %c0_5 = arith.constant 0 : index
    %c0_6 = arith.constant 0 : index
    %6 = vector.load %arg5[%c0_4, %c0_5, %c0_6] : memref<1x32x32xbf16, #tpu.memory_space<vmem>>, vector<1x32x32xbf16>
    %7 = vector.shape_cast %6 : vector<1x32x32xbf16> to vector<32x32xbf16>
    %cst = arith.constant dense<0.000000e+00> : vector<16x32xf32>
    %8 = tpu.matmul %5, %7, %cst {dimension_numbers = #tpu.dot_dimension_numbers<[1], [0], [0], [1], [0, 0, 1, 1], [], []>} : vector<16x32xbf16>, vector<32x32xbf16>, vector<16x32xf32> -> vector<16x32xf32>
    %9 = arith.addf %3, %8 : vector<16x32xf32>
    %c0_7 = arith.constant 0 : index
    %c0_8 = arith.constant 0 : index
    %10 = vector.load %arg8[%c0_7, %c0_8] : memref<16x32xf32, #tpu.memory_space<vmem>>, vector<16x32xf32>
    tpu.vector_store %arg8[%c0_7, %c0_8], %9 {strides = array<i32>} : memref<16x32xf32, #tpu.memory_space<vmem>>, vector<16x32xf32>,
    %c0_i32_9 = arith.constant 0 : i32
    %11 = arith.cmpi eq, %arg3, %c0_i32_9 : i32
    %12 = arith.extui %11 : i1 to i32
    %c0_i32_10 = arith.constant 0 : i32
    %13 = arith.cmpi ne, %12, %c0_i32_10 : i32
    scf.if %13 {
      %c0_11 = arith.constant 0 : index
      %c0_12 = arith.constant 0 : index
      %14 = vector.load %arg8[%c0_11, %c0_12] : memref<16x32xf32, #tpu.memory_space<vmem>>, vector<16x32xf32>
      %c0_13 = arith.constant 0 : index
      %c0_14 = arith.constant 0 : index
      %c0_15 = arith.constant 0 : index
      %15 = vector.load %arg6[%c0_13, %c0_14, %c0_15] : memref<1x1x32xf32, #tpu.memory_space<vmem>>, vector<1x1x32xf32>
      %16 = vector.shape_cast %15 : vector<1x1x32xf32> to vector<1x32xf32>
      %17 = vector.broadcast %16 : vector<1x32xf32> to vector<16x32xf32>
      %18 = arith.addf %14, %17 : vector<16x32xf32>
      %c0_16 = arith.constant 0 : index
      %c0_17 = arith.constant 0 : index
      %c0_18 = arith.constant 0 : index
      %19 = vector.load %arg7[%c0_16, %c0_17, %c0_18] : memref<1x16x32xf32, #tpu.memory_space<vmem>>, vector<1x16x32xf32>
      %20 = vector.shape_cast %19 : vector<1x16x32xf32> to vector<16x32xf32>
      %21 = vector.shape_cast %18 : vector<16x32xf32> to vector<1x16x32xf32>
      tpu.vector_store %arg7[%c0_16, %c0_17, %c0_18], %21 {strides = array<i32>} : memref<1x16x32xf32, #tpu.memory_space<vmem>>, vector<1x16x32xf32>,
    } else {
    }
    return
  }
  func.func @transform_0(%arg0: i32, %arg1: i32, %arg2: i32, %arg3: i32) -> (i32, i32) {
    %c0_i32 = arith.constant 0 : i32
    return %arg1, %arg3 : i32, i32
  }
  func.func @transform_1(%arg0: i32, %arg1: i32, %arg2: i32, %arg3: i32) -> (i32, i32, i32) {
    %c0_i32 = arith.constant 0 : i32
    return %arg0, %arg3, %arg2 : i32, i32, i32
  }
  func.func @transform_2(%arg0: i32, %arg1: i32, %arg2: i32, %arg3: i32) -> (i32, i32, i32) {
    %c0_i32 = arith.constant 0 : i32
    %c0_i32_0 = arith.constant 0 : i32
    return %arg0, %c0_i32, %arg2 : i32, i32, i32
  }
  func.func @transform_3(%arg0: i32, %arg1: i32, %arg2: i32, %arg3: i32) -> (i32, i32, i32) {
    %c0_i32 = arith.constant 0 : i32
    return %arg0, %arg1, %arg2 : i32, i32, i32
  }
}

</mosaic_0001>

<bundles_post_ra>
// kernel: tpu_custom_call.1
= control target key start
LH: loop header
LB: loop body
LE: loop exit
PB: predicated region body
PF: predicated region fallthrough
CT: control target
= control target key end

     0   :  { %8 = vsyncpa [#allocation4], 0  ;;  %s997_s0 = inlined_call_operand.hbm [shape: f32[16,32], index: 0, kind: input, shape index: {}]   ;;  %s998_s1 = inlined_call_operand.hbm [shape: bf16[3,32,32], index: 1, kind: input, shape index: {}]   ;;  %s999_s2 = inlined_call_operand.vmem [shape: f32[3,1,32], index: 2, kind: input, shape index: {}]   ;;  %s1000_s3 = inlined_call_operand.hbm [shape: f32[3,16,32], index: 3, kind: output, shape index: {}]  }
   0x1   :  { %9 = vsyncpa [#allocation7], 0 }
   0x2   :  { %11 = vsyncpa [#allocation7 + $0x1], 0 }
   0x3   :  { %12 = vsyncpa [#allocation5], 0 }
   0x4   :  { %14 = vsyncpa [#allocation5 + $0x1], 0  ;;  %s802_s12 = smov 0   ;;  %s804_s13 = smov 0  }
   0x5   :  { %s806_s14 = smov 0   ;;  %s808_s15 = smov 0  }
   0x6   :  { %s810_s16 = smov 0   ;;  %s812_s17 = smov 0  }
   0x7 LB: > { %s514_s18 = sadd.s32 4294967295, %s769_s17   ;;  %s515_s19 = sadd.s32 4294967294, %s769_s17   ;;  %s769_s17 = sphi %s812_s17, %s20_s17   ;;  %s765_s16 = sphi %s810_s16, %s1017_s16   ;;  %s761_s15 = sphi %s808_s15, %s1016_s15   ;;  %s757_s14 = sphi %s806_s14, %s1015_s14   ;;  %s753_s13 = sphi %s804_s13, %s1014_s13   ;;  %s749_s12 = sphi %s802_s12, %s1013_s12  }
   0x8   : > { %p98_p0 = scmp.ne.s32.totalorder %s753_s13, %s749_s12  ;;  %p836_p1 = scmp.eq.s32.totalorder %s514_s18, 0 }
   0x9   : > { %p840_p2 = scmp.eq.s32.totalorder %s514_s18, 2  ;;  %p160_p3 = scmp.eq.s32.totalorder %s515_s19, 2 }
   0xa   : > { %p846_p4 = por %p836_p1, %p98_p0  ;;  %p516_p5 = scmp.ge.s32.totalorder %s769_s17, 1 }
   0xb   : > { %p851_p6 = por %p160_p3, %p98_p0  ;;  %p167_p7 = scmp.lt.s32.totalorder %s769_s17, 4 }
   0xc   : > { %s771_s25 = smov [#allocation3]   ;;  %s46_s28 = sadd.s32 1, %s765_s16 }
   0xd   : > { %s1005_s23 = scalar_select %p851_p6, 1, 0 }
   0xe   : > { %p856_p8 = pnand %p516_p5, %p167_p7  ;;  %s183_s26 = sshll.u32 %s771_s25, 4  ;;  %s184_s26 = int_to_ptr.vmem [resolvable:$true] %s183_s26 }
   0xf   : > { %s642_s29 = scalar_lea.vmem %s184_s26, 256  ;;  %p650_p3 = scmp.lt.s32.totalorder %s184_s26, %s184_s26 }
  0x10   : > { %p556_p9 = pneg %p856_p8  ;;  %p643_p12 = scmp.ne.s32.totalorder %s184_s26, %s642_s29 }
  0x11   : > { %p651_p5 = scmp.lt.s32.totalorder %s642_s29, %s642_s29 }
  0x12   : > { %p864_p10 = pnand %p556_p9, %p836_p1 }
  0x13   : > { %p652_p7 = por %p651_p5, %p650_p3 }
  0x14   : > { %p633_p11 = pneg %p864_p10 }
  0x16   : > { %p645_p13 = pnand %p643_p12, %p633_p11 }
  0x18   : > { %p646_p0 = pneg %p645_p13 }
  0x1a   : > { %p653_p6 = pnand %p652_p7, %p646_p0 }
  0x1c   : > { %656 = shalt.err (!%p653_p6)
}
  0x1d   : > { %s772_s30 = smov 128   ;;  %s773_s4 = smov 8  }
  0x1e   : > { %559 = dma.hbm_to_vmem [thread:$0]  (!%p864_p10), %s997_s0, 256, %s184_s26, [#allocation4], %s772_s30, %s772_s30, %s773_s4  }
  0x1f   : > { %p48_p9 = scmp.ge.s32.totalorder %s46_s28, 3  ;;  %s85_s7 = sadd.s32 1, %s757_s14 }
  0x20   : > { %p92_p6 = scmp.ne.s32.totalorder %s757_s14, %s753_s13  ;;  %p93_p11 = scmp.eq.s32.totalorder %s769_s17, 0 }
  0x21   : > { %s1019_s28 = smov (%p48_p9, %s46_s28), 0  ;;  %p569_p0 = scmp.lt.s32.totalorder %s769_s17, 3 }
  0x22   : > { %p882_p12 = por %p93_p11, %p92_p6  ;;  %p888_p13 = por %p840_p2, %p92_p6 }
  0x23   : > { %s78_s10 = ssub.s32 %s765_s16, %s1019_s28  ;;  %s197_s11 = sand.u32 1, %s757_s14  }
  0x24   : > { %s1009_s9 = scalar_select %p888_p13, 1, 0 }
  0x25   : > { %p83_p10 = scmp.eq.s32.totalorder %s78_s10, 0  ;;  %s519_s18 = sshll.u32 %s197_s11, 4 }
  0x26   : > { %s535_s25 = sshll.u32 %s765_s16, 8  ;;  %s201_s30 = scalar_lea.vmem [#allocation6], %s519_s18 }
  0x27   : > { %s897_s19 = scalar_select %p83_p10, %s757_s14, %s85_s7  }
  0x28   : > { %s210_s29 = scalar_lea.hbm %s998_s1, %s535_s25  ;;  %s211_s4 = sshll.u32 %s201_s30, 4  ;;  %s212_s4 = int_to_ptr.vmem [resolvable:$true] %s211_s4 }
  0x29   : > { %p905_p2 = pnand %p569_p0, %p882_p12  ;;  %s198_s5 = scalar_lea.sflag [#allocation7], %s197_s11 }
  0x2a   : > { %s670_s6 = scalar_lea.vmem %s212_s4, 256  ;;  %s774_s7 = smov [#allocation6]  }
  0x2b   : > { %p659_p3 = pneg %p905_p2  ;;  %p671_p5 = scmp.ne.s32.totalorder %s212_s4, %s670_s6 }
  0x2c   : > { %s675_s10 = sshll.u32 %s774_s7, 4  ;;  %s676_s10 = int_to_ptr.vmem [resolvable:$false] %s675_s10 }
  0x2d   : > { %p673_p7 = pnand %p671_p5, %p659_p3  ;;  %s677_s25 = scalar_lea.vmem %s676_s10, 512 }
  0x2e   : > { %p678_p6 = scmp.lt.s32.totalorder %s212_s4, %s676_s10  ;;  %p679_p11 = scmp.lt.s32.totalorder %s677_s25, %s670_s6 }
  0x2f   : > { %p674_p9 = pneg %p673_p7 }
  0x30   : > { %p680_p10 = por %p679_p11, %p678_p6 }
  0x32   : > { %p681_p13 = pnand %p680_p10, %p674_p9 }
  0x34   : > { %684 = shalt.err (!%p681_p13)
}
  0x35   : > { %s775_s8 = smov 64   ;;  %s776_s18 = smov 4  }
  0x36   : > { %563 = dma.hbm_to_vmem [thread:$0]  (!%p905_p2), %s210_s29, 256, %s212_s4, %s198_s5, %s775_s8, %s775_s8, %s776_s18  }
  0x37   : > { %232 = sbr.rel (%p856_p8) target bundleno = 297 (0x129), region = 32 }
  0x3c   : > { %736 = dma.done.wait (%p836_p1), [#allocation4], 256  }
  0x3d   : > { %738 = vsyncadd (%p836_p1), [#allocation4], 4294967040  ;;  %s920_s11 = sand.u32 1, %s753_s13  }
  0x3e   : > { %s524_s26 = sshll.u32 %s920_s11, 4  ;;  %s239_s27 = scalar_lea.sflag [#allocation7], %s920_s11 }
  0x3f   : > { %s242_s29 = scalar_lea.vmem [#allocation6], %s524_s26 }
  0x40   : > { %740 = dma.done.wait (%p846_p4), %s239_s27, 256  }
  0x41   : > { %742 = vsyncadd (%p846_p4), %s239_s27, 4294967040  ;;  %vm285_vm0 = vcmask 261120   ;;  %v777_v0 = vmov 0.0   ;;  %vm778_vm1 = vmmov 0   ;;  %v629_v1 = vld [vmem:[%s242_s29 + $0x8] sm:$0xff]   ;;  %v630_v2 = vld [vmem:[%s242_s29] sm:$0xff]  }
  0x42   : > { %540 = vmatprep.subr.bf16.mxu0 %v777_v0  ;;  %544 = vmatprep.mubr.msk.bf16.mxu0 %vm778_vm1, %v777_v0  ;;  %286 = vst.msk [vmem:[#allocation2] sm:$0xff] %vm285_vm0, %v777_v0  ;;  %287 = vst.msk [vmem:[#allocation2 + $0x8] sm:$0xff] %vm285_vm0, %v777_v0  ;;  %v290_v3 = vld [vmem:[#allocation3] sm:$0xff]  ;;  %v291_v4 = vld [vmem:[#allocation3 + $0x8] sm:$0xff]  ;;  %p273_p1 = scmp.lt.s32.totalorder %s761_s15, 2  ;;  %s536_s4 = sshll.u32 %s761_s15, 8 }
  0x43   : > { %541 = vmatpush3.bf16.msra.mxu0 %v629_v1  ;;  %v292_v5 = vpack.c.bf16 %v291_v4, %v290_v3  ;;  %s270_s21 = scalar_lea.vmem [#allocation8], %s524_s26  ;;  %s947_s10 = scalar_lea.hbm %s1000_s3, %s536_s4 }
  0x44   : > { %542 = vmatprep.subr.bf16.mxu0 %v777_v0  ;;  %s274_s20 = scalar_select %p273_p1, %s761_s15, 2 }
  0x45   : > { %s391_s5 = sshll.u32 %s270_s21, 4  ;;  %s375_s15 = scalar_lea.sflag [#allocation5], %s920_s11  ;;  %s949_s5 = int_to_ptr.vmem [resolvable:$true] %s391_s5 }
  0x46   : > { %s278_s30 = scalar_lea.vmem %s999_s2, %s274_s20  ;;  %s685_s25 = scalar_lea.vmem %s949_s5, 256 }
  0x47   : > { %543 = vmatpush3.bf16.msra.mxu0 %v630_v2  ;;  %v529_v14 = vld [vmem:[%s278_s30] ss:$0 sm:$0xff]  ;;  %p686_p4 = scmp.ne.s32.totalorder %s949_s5, %s685_s25  ;;  %p1011_p8 = scmp.ne.s32.totalorder %s1009_s9, 0 }
  0x48   : > { %s779_s8 = smov [#allocation8]  }
  0x49   : > { %v288_v6 = vld [vmem:[#allocation2] sm:$0xff]  ;;  %v289_v10 = vld [vmem:[#allocation2 + $0x8] sm:$0xff]  ;;  %p687_p12 = pnand %p686_p4, %p1011_p8  ;;  %s689_s18 = sshll.u32 %s779_s8, 4  ;;  %s690_s18 = int_to_ptr.vmem [resolvable:$false] %s689_s18 }
  0x4a   : > { %545 = vmatmul.mubr.msk.bf16.vlgmr.msra.gmra.mxu0 %vm285_vm0, %v292_v5  ;;  %s691_s26 = scalar_lea.vmem %s690_s18, 512  ;;  %p692_p0 = scmp.lt.s32.totalorder %s949_s5, %s690_s18 }
  0x4b   : > { %p688_p13 = pneg %p687_p12  ;;  %p693_p2 = scmp.lt.s32.totalorder %s691_s26, %s685_s25 }
  0x4d   : > { %p694_p3 = por %p693_p2, %p692_p0 }
  0x4f   : > { %p695_p5 = pnand %p694_p3, %p688_p13 }
 0x10a   : > { %v347_v7 = vpop.f32.mrf.mxu0 }
 0x10b   : > { %v354_v8 = vadd.f32 %v347_v7, %v288_v6 }
 0x10c   : > { %v546_v9 = vpop.f32.mrf.mxu0 }
 0x10d   : > { %356 = vst.msk [vmem:[#allocation2] sm:$0xff] %vm285_vm0, %v354_v8 }
 0x10e   : > { %v350_v11 = vpop.f32.mrf.mxu0 }
 0x10f   : > { %v355_v12 = vadd.f32 %v350_v11, %v289_v10 }
 0x110   : > { %v547_v13 = vpop.f32.mrf.mxu0 }
 0x111   : > { %357 = vst.msk [vmem:[#allocation2 + $0x8] sm:$0xff] %vm285_vm0, %v355_v12 }
 0x114   : > { %v361_v15 = vld [vmem:[#allocation2] sm:$0xff] }
 0x115   : > { %v370_v16 = vadd.f32 %v529_v14, %v361_v15 }
 0x117   : > { %372 = vst.msk [vmem:[%s270_s21] sm:$0xff] %vm285_vm0, %v370_v16 }
 0x118   : > { %v362_v17 = vld [vmem:[#allocation2 + $0x8] sm:$0xff] }
 0x119   : > { %v371_v18 = vadd.f32 %v529_v14, %v362_v17 }
 0x11b   : > { %373 = vst.msk [vmem:[%s270_s21 + $0x8] sm:$0xff] %vm285_vm0, %v371_v18 }
 0x11c   : > { %698 = shalt.err (!%p695_p5)
}
 0x11d   : > { %s699_s27 = scalar_lea.hbm %s947_s10, 256  ;;  %s703_s22 = scalar_lea.hbm %s1000_s3, 768 }
 0x11e   : > { %p700_p7 = scmp.ne.s32.totalorder %s947_s10, %s699_s27  ;;  %p704_p11 = scmp.lt.s32.totalorder %s947_s10, %s1000_s3 }
 0x11f   : > { %p705_p10 = scmp.lt.s32.totalorder %s703_s22, %s699_s27 }
 0x120   : > { %p701_p9 = pnand %p700_p7, %p1011_p8 }
 0x121   : > { %p706_p1 = por %p705_p10, %p704_p11 }
 0x122   : > { %p702_p6 = pneg %p701_p9 }
 0x124   : > { %p707_p4 = pnand %p706_p1, %p702_p6 }
 0x126   : > { %710 = shalt.err (!%p707_p4)
}
 0x127   : > { %s780_s4 = smov 128   ;;  %s781_s21 = smov 8  }
 0x128   : > { %554 = dma.vmem_to_hbm [thread:$0]  (%p1011_p8), %s949_s5, 256, %s947_s10, %s375_s15, %s780_s4, %s780_s4, %s781_s21  }
 0x129 PF: > { %p571_p12 = scmp.ge.s32.totalorder %s769_s17, 2  ;;  %s406_s6 = sand.u32 1, %s749_s12  }
 0x12a   : > { %p1012_p13 = scmp.ne.s32.totalorder %s1005_s23, 0  ;;  %s407_s7 = scalar_lea.sflag [#allocation5], %s406_s6 }
 0x12c   : > { %p565_p0 = pnand %p571_p12, %p1012_p13 }
 0x12e   : > { %p566_p2 = pneg %p565_p0 }
 0x130   : > { %744 = dma.done.wait (%p566_p2), %s407_s7, 256  }
 0x131   : > { %746 = vsyncadd (%p566_p2), %s407_s7, 4294967040  ;;  %s20_s17 = sadd.s32 1, %s769_s17   ;;  %s1013_s12 = smov %s753_s13 }
 0x132   : > { %p17_p3 = scmp.ge.s32.totalorder %s20_s17, 5   ;;  %s1014_s13 = smov %s757_s14 }
 0x133   : > { %s1015_s14 = smov %s897_s19  ;;  %s1016_s15 = smov %s765_s16 }
 0x134   : > { %s1017_s16 = smov %s1019_s28  ;;  %19 = sbr.rel (!%p17_p3) target bundleno = 7 (0x7), region = 94 }
 0x139   :  { %412 = vsyncpa [#allocation4], 1 }
 0x13a   :  { %414 = vsyncpa [#allocation4 + $0x1], 1 }
 0x13b   :  { %415 = vsyncpa [#allocation7], 1 }
 0x13c   :  { %417 = vsyncpa [#allocation7 + $0x1], 1 }
 0x13d   :  { %418 = vsyncpa [#allocation5], 1 }
 0x13e   :  { %420 = vsyncpa [#allocation5 + $0x1], 1 }

</bundles_post_ra>
